<compile_context>
chip_gen: v5e
topology: v5e:2x2
jax: 0.10.0
libtpu: 0.0.40
codegen_flags: <defaults>
</compile_context>

<pallas_src>
import functools

import jax
import jax.numpy as jnp
from jax.experimental import pallas as pl
from jax.experimental.pallas import tpu as pltpu


def _round_up(x, m):
    return ((x + m - 1) // m) * m


# ---------------------------------------------------------------------------
# Kernels: one-hot gather on the MXU.
#   idx_ref : (tile_n, 1) int32, already clamped + offset into [0, 2*maxlen)
#   tab_ref : (2*maxlen, d_tab) full table, VMEM-resident across the grid
#             (constant index_map + Buffered(1) -> single DMA, single buffer)
# Each grid step writes one lane-dense (tile_n, d_pad) output block.
# ---------------------------------------------------------------------------

def _gather_k_kernel(idx_ref, tab_ref, ok_ref):
    tile_n = idx_ref.shape[0]
    nrows = tab_ref.shape[0]
    rows = jax.lax.broadcasted_iota(jnp.int32, (tile_n, nrows), 1)
    onehot = (rows == idx_ref[...]).astype(tab_ref.dtype)
    # One-hot selection is exact in any accumulation dtype, so emit the MXU
    # result directly in the output dtype (no extra VPU astype pass).
    ok_ref[...] = jnp.dot(onehot, tab_ref[...],
                          preferred_element_type=ok_ref.dtype)


def _gather_kv_kernel(idx_ref, tab_ref, ok_ref, ov_ref):
    # tab_ref holds [pe_k | pe_v] concatenated on the feature axis: the
    # one-hot LHS streams through the MXU ONCE for both tables.
    tile_n = idx_ref.shape[0]
    nrows = tab_ref.shape[0]
    d_half = ok_ref.shape[1]            # multiple of 128 -> lane-aligned halves
    rows = jax.lax.broadcasted_iota(jnp.int32, (tile_n, nrows), 1)
    onehot = (rows == idx_ref[...]).astype(tab_ref.dtype)
    res = jnp.dot(onehot, tab_ref[...], preferred_element_type=ok_ref.dtype)
    ok_ref[...] = res[:, :d_half]
    ov_ref[...] = res[:, d_half:]


def _choose_tile_n(n, cap):
    """Rows per grid step: large (amortize ~0.35us/step), multiple of 8,
    >=2 steps when there is enough work (v7x megacore), and dividing n exactly
    when possible (so no output padding -> no post-call slice copy)."""
    n8 = _round_up(n, 8)
    if n8 <= cap:
        # Whole problem fits in one tile.  Split into two equal grid steps so
        # the "parallel" axis can use both v7x TensorCores, as long as each
        # half is still a decent tile and no padding appears.
        if n == n8 and n % 16 == 0 and n >= 256:
            return n // 2
        return n8
    # Multi-step: prefer the largest multiple-of-8 tile <= cap dividing n.
    if n == n8:
        start = (cap // 8) * 8
        for cand in range(start, 127, -8):
            if n % cand == 0:
                return cand
    # Fallback: lane/MXU-friendly multiple of 128 with padding.
    return max(128, (cap // 128) * 128)


@functools.partial(jax.jit, static_argnames=("maxlen", "embed_v", "max_tile_n"))
def relative_positional_encoding(pos_seq, pe_k, pe_v=None, *, maxlen,
                                 embed_v=False, max_tile_n=2048):
    """Pallas equivalent of RelativePositionalEncoding.forward.

    pos_seq : integer array of arbitrary shape (typically (T, T))
    pe_k    : (2*maxlen, d_model) embedding table
    pe_v    : (2*maxlen, d_model) embedding table (only used if embed_v)
    returns : (pe_k[pos], pe_v[pos] or None), each pos_seq.shape + (d_model,)
    """
    two_maxlen, d_model = pe_k.shape
    if two_maxlen != 2 * maxlen:
        raise ValueError(f"pe_k has {two_maxlen} rows, expected 2*maxlen={2*maxlen}")
    if not jnp.issubdtype(pe_k.dtype, jnp.floating):
        raise TypeError("embedding tables must be floating point (MXU has no "
                        "int matmul on v7x); cast before calling")
    if embed_v:
        if pe_v is None or pe_v.shape != pe_k.shape or pe_v.dtype != pe_k.dtype:
            raise ValueError("pe_v must match pe_k's shape/dtype when embed_v=True")

    orig_shape = pos_seq.shape
    if pos_seq.size == 0:
        z = jnp.zeros(orig_shape + (d_model,), pe_k.dtype)
        return (z, jnp.zeros_like(z)) if embed_v else (z, None)

    # Clamp + offset once, vectorized, in the wrapper (not per grid step).
    idx = jnp.clip(pos_seq.reshape(-1).astype(jnp.int32),
                   -maxlen, maxlen - 1) + maxlen
    n = idx.shape[0]

    # Pad d_model to a lane-dense multiple of 128; concat K|V for one matmul.
    # TODO(synk): pad/concat the tables once at module init instead of per
    # call when d_model is not a multiple of 128.
    d_pad = _round_up(d_model, 128)

    def _pad_d(t):
        return t if d_pad == d_model else jnp.pad(t, ((0, 0), (0, d_pad - d_model)))

    if embed_v:
        tab = jnp.concatenate([_pad_d(pe_k), _pad_d(pe_v)], axis=1)  # (2L, 2*d_pad)
    else:
        tab = _pad_d(pe_k)                                           # (2L, d_pad)
    d_tab = tab.shape[1]
    n_outs = 2 if embed_v else 1

    # ---- tile sizing against an explicit VMEM budget -----------------------
    tab_isz = jnp.dtype(pe_k.dtype).itemsize
    out_isz = tab_isz
    per_row = (2 * n_outs * d_pad * out_isz   # output tile(s), double-buffered
               + 2 * 4                        # idx tile (1 int32 column, dbl-buf)
               + two_maxlen * tab_isz         # one-hot intermediate
               + two_maxlen * 4)              # iota / compare intermediate (i32)
    fixed = two_maxlen * d_tab * tab_isz      # resident table, single-buffered
    budget = 40 * 1024 * 1024                 # working set; v7x has 64 MiB/TC
    tile_cap = min(max_tile_n, max(8, (budget - fixed) // per_row))
    # TODO(synk): for very large maxlen the resident table / one-hot matmul
    # stops fitting (and flips MXU-bound); that regime wants a table-tiled
    # reduction or an in-kernel jnp.take gather instead.

    tile_n = _choose_tile_n(n, tile_cap)
    n_pad = _round_up(n, tile_n)
    if n_pad != n:
        idx = jnp.pad(idx, (0, n_pad - n))    # padded rows gather row 0, cropped later
    idx2d = idx.reshape(n_pad, 1)
    grid = (n_pad // tile_n,)

    idx_spec = pl.BlockSpec((tile_n, 1), lambda i: (i, 0))
    tab_spec = pl.BlockSpec((two_maxlen, d_tab), lambda i: (0, 0),
                            pipeline_mode=pl.Buffered(buffer_count=1))
    out_spec = pl.BlockSpec((tile_n, d_pad), lambda i: (i, 0))

    est = fixed + tile_n * per_row
    vmem_limit = int(min(48 * 1024 * 1024,                 # v7x: leave headroom
                         max(32 * 1024 * 1024, int(est * 1.5))))
    compiler_params = pltpu.CompilerParams(
        dimension_semantics=("parallel",),
        vmem_limit_bytes=vmem_limit,
    )
    cost = pl.CostEstimate(
        flops=2 * n_pad * two_maxlen * d_tab,
        transcendentals=0,
        bytes_accessed=(n_pad * 4
                        + two_maxlen * d_tab * tab_isz
                        + n_outs * n_pad * d_pad * out_isz),
    )

    def _crop(o):
        # Skip the slice (a second full HBM copy) when nothing was padded.
        if n_pad != n or d_pad != d_model:
            o = o[:n, :d_model]
        return o.reshape(orig_shape + (d_model,))

    if embed_v:
        grid_spec = pltpu.PrefetchScalarGridSpec(
            num_scalar_prefetch=0, grid=grid,
            in_specs=[idx_spec, tab_spec],
            out_specs=[out_spec, out_spec])
        out_k, out_v = pl.pallas_call(
            _gather_kv_kernel,
            grid_spec=grid_spec,
            out_shape=(jax.ShapeDtypeStruct((n_pad, d_pad), pe_k.dtype),
                       jax.ShapeDtypeStruct((n_pad, d_pad), pe_v.dtype)),
            compiler_params=compiler_params,
            cost_estimate=cost,
        )(idx2d, tab)
        return _crop(out_k), _crop(out_v)
    else:
        grid_spec = pltpu.PrefetchScalarGridSpec(
            num_scalar_prefetch=0, grid=grid,
            in_specs=[idx_spec, tab_spec],
            out_specs=out_spec)
        out_k = pl.pallas_call(
            _gather_k_kernel,
            grid_spec=grid_spec,
            out_shape=jax.ShapeDtypeStruct((n_pad, d_pad), pe_k.dtype),
            compiler_params=compiler_params,
            cost_estimate=cost,
        )(idx2d, tab)
        return _crop(out_k), None


def _reference(pos_seq, pe_k, pe_v, maxlen, embed_v):
    pos = jnp.clip(pos_seq, -maxlen, maxlen - 1) + maxlen
    out_k = jnp.take(pe_k, pos, axis=0)
    if embed_v:
        return out_k, jnp.take(pe_v, pos, axis=0)
    return out_k, None


if __name__ == "__main__":
    d_model = 128
    maxlen = 8
    seq_len = 16  # longer than maxlen so clamping is exercised

    key = jax.random.PRNGKey(0)
    k_key, v_key = jax.random.split(key)
    # Deterministic synthetic weights (nn.Embedding(2*maxlen, d_model).weight)
    pe_k_table = jax.random.normal(k_key, (2 * maxlen, d_model), jnp.float32)
    pe_v_table = jax.random.normal(v_key, (2 * maxlen, d_model), jnp.float32)

    # Typical conformer usage: relative positions pos[i, j] = i - j
    t = jnp.arange(seq_len, dtype=jnp.int32)
    pos_seq = t[:, None] - t[None, :]          # (16, 16), values in [-15, 15]

    # embed_v=False path (module default)
    out_k, out_v = relative_positional_encoding(
        pos_seq, pe_k_table, maxlen=maxlen, embed_v=False)
    out_k = jax.block_until_ready(out_k)
    assert out_v is None
    ref_k, _ = _reference(pos_seq, pe_k_table, None, maxlen, False)
    assert out_k.shape == (seq_len, seq_len, d_model)
    assert jnp.allclose(out_k, ref_k)

    # embed_v=True path (fused single wide matmul for K and V)
    out_k2, out_v2 = relative_positional_encoding(
        pos_seq, pe_k_table, pe_v_table, maxlen=maxlen, embed_v=True)
    out_k2 = jax.block_until_ready(out_k2)
    out_v2 = jax.block_until_ready(out_v2)
    ref_k2, ref_v2 = _reference(pos_seq, pe_k_table, pe_v_table, maxlen, True)
    assert jnp.allclose(out_k2, ref_k2)
    assert jnp.allclose(out_v2, ref_v2)

    print("KERNEL_OK")
</pallas_src>

<mosaic_0001>
module attributes {stable_mosaic.version = 11 : i64} {
  func.func @_gather_k_kernel(%arg0: i32, %arg1: memref<128x1xi32, #tpu.memory_space<vmem>>, %arg2: memref<16x128xf32, #tpu.memory_space<vmem>>, %arg3: memref<128x128xf32, #tpu.memory_space<vmem>>) attributes {dimension_semantics = [#tpu.dimension_semantics<parallel>], iteration_bounds = array<i64: 2>, scalar_prefetch = 0 : i64, scratch_operands = 0 : i64, tpu.core_type = #tpu.core_type<tc>, window_params = [{transform_indices = @transform_0, window_bounds = array<i64: 128, 1>}, {pipeline_mode = #tpu.pipeline_mode<synchronous>, transform_indices = @transform_1, window_bounds = array<i64: 16, 128>}, {transform_indices = @transform_2, window_bounds = array<i64: 128, 128>}]} {
    %0 = tpu.iota {dimensions = array<i32: 1>} : vector<128x16xi32>
    %c0 = arith.constant 0 : index
    %c0_0 = arith.constant 0 : index
    %1 = vector.load %arg1[%c0, %c0_0] : memref<128x1xi32, #tpu.memory_space<vmem>>, vector<128x1xi32>
    %2 = vector.broadcast %1 : vector<128x1xi32> to vector<128x16xi32>
    %3 = arith.cmpi eq, %0, %2 : vector<128x16xi32>
    %4 = arith.extui %3 : vector<128x16xi1> to vector<128x16xi32>
    %5 = arith.sitofp %4 : vector<128x16xi32> to vector<128x16xf32>
    %c0_1 = arith.constant 0 : index
    %c0_2 = arith.constant 0 : index
    %6 = vector.load %arg2[%c0_1, %c0_2] : memref<16x128xf32, #tpu.memory_space<vmem>>, vector<16x128xf32>
    %cst = arith.constant dense<0.000000e+00> : vector<128x128xf32>
    %7 = tpu.matmul %5, %6, %cst {dimension_numbers = #tpu.dot_dimension_numbers<[1], [0], [0], [1], [0, 0, 1, 1], [], []>} : vector<128x16xf32>, vector<16x128xf32>, vector<128x128xf32> -> vector<128x128xf32>
    %c0_3 = arith.constant 0 : index
    %c0_4 = arith.constant 0 : index
    %8 = vector.load %arg3[%c0_3, %c0_4] : memref<128x128xf32, #tpu.memory_space<vmem>>, vector<128x128xf32>
    tpu.vector_store %arg3[%c0_3, %c0_4], %7 {strides = array<i32>} : memref<128x128xf32, #tpu.memory_space<vmem>>, vector<128x128xf32>,
    return
  }
  func.func @transform_0(%arg0: i32) -> (i32, i32) {
    %c0_i32 = arith.constant 0 : i32
    %c0_i32_0 = arith.constant 0 : i32
    return %arg0, %c0_i32 : i32, i32
  }
  func.func @transform_1(%arg0: i32) -> (i32, i32) {
    %c0_i32 = arith.constant 0 : i32
    %c0_i32_0 = arith.constant 0 : i32
    %c0_i32_1 = arith.constant 0 : i32
    return %c0_i32, %c0_i32_0 : i32, i32
  }
  func.func @transform_2(%arg0: i32) -> (i32, i32) {
    %c0_i32 = arith.constant 0 : i32
    %c0_i32_0 = arith.constant 0 : i32
    return %arg0, %c0_i32 : i32, i32
  }
}

</mosaic_0001>

<bundles_post_ra>
// kernel: relative_positional_encoding.1
= control target key start
LH: loop header
LB: loop body
LE: loop exit
PB: predicated region body
PF: predicated region fallthrough
CT: control target
= control target key end

     0   :  { %7 = vsyncpa [#allocation3], 0  ;;  %s814_s0 = inlined_call_operand.vmem [shape: s32[256,1], index: 0, kind: input, shape index: {}]   ;;  %s815_s1 = inlined_call_operand.vmem [shape: f32[16,128], index: 1, kind: input, shape index: {}]   ;;  %s816_s2 = inlined_call_operand.hbm [shape: f32[256,128], index: 2, kind: output, shape index: {}]  }
   0x1   :  { %9 = vsyncpa [#allocation3 + $0x1], 0  ;;  %s649_s9 = smov 0   ;;  %s651_s10 = smov 0  }
   0x2   :  { %s653_s11 = smov 0   ;;  %s655_s12 = smov 0  }
   0x3 LB: > { %s670_s13 = sadd.s32 4294967295, %s628_s12   ;;  %s469_s14 = sadd.s32 4294967294, %s628_s12   ;;  %s628_s12 = sphi %s655_s12, %s822_s12   ;;  %s624_s11 = sphi %s653_s11, %s821_s11   ;;  %s620_s10 = sphi %s651_s10, %s820_s10   ;;  %s616_s9 = sphi %s649_s9, %s819_s9  }
   0x4   : > { %s674_s15 = sadd.s32 1, %s628_s12   ;;  %s69_s16 = sadd.s32 1, %s624_s11 }
   0x5   : > { %s66_s17 = ssub.s32 %s628_s12, %s674_s15  ;;  %p79_p0 = scmp.ne.s32.totalorder %s624_s11, %s620_s10 }
   0x6   : > { %p67_p1 = scmp.eq.s32.totalorder %s66_s17, 0  ;;  %p80_p2 = scmp.eq.s32.totalorder %s670_s13, 1 }
   0x7   : > { %p85_p3 = scmp.ne.s32.totalorder %s620_s10, %s616_s9  ;;  %p86_p4 = scmp.eq.s32.totalorder %s469_s14, 1 }
   0x8   : > { %s685_s18 = scalar_select %p67_p1, %s624_s11, %s69_s16  }
   0x9   : > { %p687_p5 = por %p80_p2, %p79_p0  ;;  %p691_p6 = por %p86_p4, %p85_p3 }
   0xa   : > { %p472_p7 = scmp.ge.s32.totalorder %s628_s12, 1  ;;  %p116_p8 = scmp.lt.s32.totalorder %s628_s12, 3 }
   0xc   : > { %p117_p9 = pnand %p472_p7, %p116_p8 }
   0xd   : > { %s474_s21 = sshll.u32 (!%p117_p9), %s670_s13, 4  ;;  %s135_s30 = sand.u32 (!%p117_p9), 1, %s620_s10  }
   0xe   : > { %120 = sbr.rel (%p117_p9) target bundleno = 311 (0x137), region = 28  ;;  %p139_p10 = scmp.lt.s32.totalorder (!%p117_p9), %s474_s21, 31 }
   0xf   : > { %s473_s3 = sshll.u32 (!%p117_p9), %s135_s30, 7  ;;  %s513_s5 = sshll.u32 (!%p117_p9), %s670_s13, 7 }
  0x10   : > { %s762_s4 = scalar_lea.vmem (!%p117_p9), [#allocation2], %s473_s3  ;;  %s403_s8 = scalar_lea.hbm (!%p117_p9), %s816_s2, %s513_s5 }
  0x11   : > { %s404_s14 = sshll.u32 (!%p117_p9), %s762_s4, 4  ;;  %s406_s16 = sshll.u32 (!%p117_p9), %s403_s8, 4  ;;  %s405_s14 = int_to_ptr.vmem [resolvable:$true] %s404_s14  ;;  %s407_s16 = int_to_ptr.hbm [resolvable:$true] %s406_s16 }
  0x12   : > { %s392_s13 = scalar_lea.sflag (!%p117_p9), [#allocation3], %s135_s30  ;;  %s580_s17 = sshra.s32 (!%p117_p9), %s407_s16, 4  ;;  %s581_s17 = int_to_ptr.hbm [resolvable:$true] %s580_s17 }
  0x13   : > { %v630_v0 = vmov 0   ;;  %s824_s21 = smov (!%p139_p10, %s474_s21), 31  ;;  %v260_v17 = vld [vmem:[%s815_s1 + $0x8] sm:$0xff]  ;;  %v259_v18 = vld [vmem:[%s815_s1] sm:$0xff]  ;;  %v145_v20 = vlaneseq  ;;  %vm261_vm0 = vcmask 130048   ;;  %v631_v25 = vmov 0.0   ;;  %p587_p0 = scmp.lt.s32.totalorder %s581_s17, %s816_s2 }
  0x14   : > { %565 = vset.pattern.permute.xlu2 %v630_v0  ;;  %564 = vset.pattern.permute.xlu1 %v630_v0  ;;  %s475_s22 = sshll.u32 %s824_s21, 3  ;;  %s582_s21 = scalar_lea.hbm %s581_s17, 128 }
  0x15   : > { %563 = vset.pattern.permute.xlu0 %v630_v0  ;;  %s701_s25 = scalar_lea.vmem %s814_s0, %s475_s22  ;;  %515 = vmatpush.msra.mxu2 %v260_v17  ;;  %v725_v21 = vand.u32 127, %v145_v20  ;;  %p583_p11 = scmp.ne.s32.totalorder %s581_s17, %s582_s21 }
  0x16   : > { %v156_v1 = vld [vmem:[%s701_s25 + $0x48] sm:$0xff]  ;;  %v155_v2 = vld [vmem:[%s701_s25 + $0x40] sm:$0xff]  ;;  %v157_v7 = vld [vmem:[%s701_s25 + $0x50] sm:$0xff]  ;;  %324 = vmatpush.msra.mxu0 %v260_v17  ;;  %514 = vmatpush.msra.mxu1 %v260_v17  ;;  %s586_s24 = scalar_lea.hbm %s816_s2, 256 }
  0x17   : > { %v147_v3 = vld [vmem:[%s701_s25] sm:$0xff]  ;;  %191 = vperm.xlu2 %565, %v156_v1   ;;  %188 = vperm.xlu0 %563, %v155_v2   ;;  %v160_v4 = vld [vmem:[%s701_s25 + $0x68] sm:$0xff]  ;;  %v153_v10 = vld [vmem:[%s701_s25 + $0x30] sm:$0xff]  ;;  %p584_p12 = pnand %p583_p11, %p687_p5  ;;  %p588_p1 = scmp.lt.s32.totalorder %s586_s24, %s582_s21 }
  0x18   : > { %164 = vperm.xlu1 %564, %v147_v3   ;;  %v159_v5 = vld [vmem:[%s701_s25 + $0x60] sm:$0xff]  ;;  %v148_v8 = vld [vmem:[%s701_s25 + $0x8] sm:$0xff]  ;;  %v161_v11 = vld [vmem:[%s701_s25 + $0x70] sm:$0xff]  ;;  %516 = vmatpush.msra.mxu3 %v260_v17 }
  0x19   : > { %v151_v6 = vld [vmem:[%s701_s25 + $0x20] sm:$0xff]  ;;  %v152_v9 = vld [vmem:[%s701_s25 + $0x28] sm:$0xff]  ;;  %v149_v12 = vld [vmem:[%s701_s25 + $0x10] sm:$0xff]  ;;  %518 = vmatpush.msra.mxu2 %v259_v18  ;;  %325 = vmatpush.msra.mxu0 %v259_v18  ;;  %p585_p13 = pneg %p584_p12  ;;  %p589_p2 = por %p588_p1, %p587_p0 }
  0x1a   : > { %v150_v13 = vld [vmem:[%s701_s25 + $0x18] sm:$0xff]  ;;  %517 = vmatpush.msra.mxu1 %v259_v18  ;;  %519 = vmatpush.msra.mxu3 %v259_v18 }
  0x1b   : > { %v158_v14 = vld [vmem:[%s701_s25 + $0x58] sm:$0xff]  ;;  %p590_p3 = pnand %p589_p2, %p585_p13 }
  0x1c   : > { %v162_v15 = vld [vmem:[%s701_s25 + $0x78] sm:$0xff] }
  0x1d   : > { %v154_v16 = vld [vmem:[%s701_s25 + $0x38] sm:$0xff] }
  0x1f   : > { %203 = vperm.xlu2 %565, %v160_v4   ;;  %200 = vperm.xlu0 %563, %v159_v5  }
  0x20   : > { %176 = vperm.xlu1 %564, %v151_v6  }
  0x27   : > { %194 = vperm.xlu2 %565, %v157_v7   ;;  %167 = vperm.xlu0 %563, %v148_v8  }
  0x28   : > { %179 = vperm.xlu1 %564, %v152_v9  }
  0x2f   : > { %182 = vperm.xlu2 %565, %v153_v10   ;;  %206 = vperm.xlu0 %563, %v161_v11  }
  0x30   : > { %170 = vperm.xlu1 %564, %v149_v12  }
  0x37   : > { %173 = vperm.xlu2 %565, %v150_v13   ;;  %197 = vperm.xlu0 %563, %v158_v14  }
  0x38   : > { %209 = vperm.xlu1 %564, %v162_v15  }
  0x3f   : > { %185 = vperm.xlu0 %563, %v154_v16  }
  0x71   : > { %v192_v19 = vpop.permute.xlu2 %191 }
  0x72   : > { %vm220_vm3 = vcmp.eq.s32.totalorder %v725_v21, %v192_v19 }
  0x73   : > { %v485_v28 = vsel %vm220_vm3, 1.0, %v631_v25 }
  0x79   : > { %v204_v22 = vpop.permute.xlu2 %203 }
  0x7a   : > { %vm224_vm7 = vcmp.eq.s32.totalorder %v725_v21, %v204_v22 }
  0x7b   : > { %v489_v38 = vsel %vm224_vm7, 1.0, %v631_v25 }
  0x81   : > { %v195_v30 = vpop.permute.xlu2 %194 }
  0x82   : > { %vm221_vm6 = vcmp.eq.s32.totalorder %v725_v21, %v195_v30 }
  0x83   : > { %v486_v36 = vsel %vm221_vm6, 1.0, %v631_v25 }
  0x89   : > { %v189_v23 = vpop.permute.xlu0 %188  ;;  %v183_v39 = vpop.permute.xlu2 %182 }
  0x8a   : > { %vm219_vm1 = vcmp.eq.s32.totalorder %v725_v21, %v189_v23  ;;  %v165_v24 = vpop.permute.xlu1 %164  ;;  %vm217_vm10 = vcmp.eq.s32.totalorder %v725_v21, %v183_v39 }
  0x8b   : > { %v484_v26 = vsel %vm219_vm1, 1.0, %v631_v25  ;;  %vm211_vm2 = vcmp.eq.s32.totalorder %v725_v21, %v165_v24  ;;  %v482_v44 = vsel %vm217_vm10, 1.0, %v631_v25 }
  0x8c   : > { %v476_v27 = vsel %vm211_vm2, 1.0, %v631_v25  ;;  %500 = vmatmul.msk.f32.vlgmr.msra.gmra.mxu2 %vm261_vm0, %v484_v26 }
  0x8d   : > { %492 = vmatmul.msk.f32.vlgmr.msra.gmra.mxu0 %vm261_vm0, %v476_v27 }
  0x91   : > { %v201_v29 = vpop.permute.xlu0 %200  ;;  %v174_v46 = vpop.permute.xlu2 %173 }
  0x92   : > { %vm223_vm4 = vcmp.eq.s32.totalorder %v725_v21, %v201_v29  ;;  %v177_v31 = vpop.permute.xlu1 %176  ;;  %vm214_vm13 = vcmp.eq.s32.totalorder %v725_v21, %v174_v46 }
  0x93   : > { %v488_v32 = vsel %vm223_vm4, 1.0, %v631_v25  ;;  %vm215_vm5 = vcmp.eq.s32.totalorder %v725_v21, %v177_v31  ;;  %v479_v50 = vsel %vm214_vm13, 1.0, %v631_v25 }
  0x94   : > { %v480_v33 = vsel %vm215_vm5, 1.0, %v631_v25  ;;  %501 = vmatmul.msk.f32.gmra.mxu2 %vm261_vm0, %v485_v28  ;;  %504 = vmatmul.msk.f32.vlgmr.msra.gmra.mxu3 %vm261_vm0, %v488_v32 }
  0x95   : > { %496 = vmatmul.msk.f32.vlgmr.msra.gmra.mxu1 %vm261_vm0, %v480_v33 }
  0x99   : > { %v168_v34 = vpop.permute.xlu0 %167 }
  0x9a   : > { %vm212_vm8 = vcmp.eq.s32.totalorder %v725_v21, %v168_v34  ;;  %v180_v35 = vpop.permute.xlu1 %179 }
  0x9b   : > { %v477_v37 = vsel %vm212_vm8, 1.0, %v631_v25  ;;  %vm216_vm9 = vcmp.eq.s32.totalorder %v725_v21, %v180_v35 }
  0x9c   : > { %v481_v40 = vsel %vm216_vm9, 1.0, %v631_v25  ;;  %493 = vmatmul.msk.f32.gmra.mxu0 %vm261_vm0, %v477_v37  ;;  %502 = vmatmul.msk.f32.gmra.mxu2 %vm261_vm0, %v486_v36 }
  0x9d   : > { %497 = vmatmul.msk.f32.gmra.mxu1 %vm261_vm0, %v481_v40  ;;  %505 = vmatmul.msk.f32.gmra.mxu3 %vm261_vm0, %v489_v38 }
  0xa1   : > { %v207_v41 = vpop.permute.xlu0 %206 }
  0xa2   : > { %vm225_vm11 = vcmp.eq.s32.totalorder %v725_v21, %v207_v41  ;;  %v171_v42 = vpop.permute.xlu1 %170 }
  0xa3   : > { %v490_v43 = vsel %vm225_vm11, 1.0, %v631_v25  ;;  %vm213_vm12 = vcmp.eq.s32.totalorder %v725_v21, %v171_v42 }
  0xa4   : > { %v478_v45 = vsel %vm213_vm12, 1.0, %v631_v25 }
  0xa5   : > { %494 = vmatmul.msk.f32.gmra.mxu0 %vm261_vm0, %v478_v45  ;;  %498 = vmatmul.msk.f32.gmra.mxu1 %vm261_vm0, %v482_v44 }
  0xa6   : > { %506 = vmatmul.msk.f32.gmra.mxu3 %vm261_vm0, %v490_v43 }
  0xa9   : > { %v198_v47 = vpop.permute.xlu0 %197 }
  0xaa   : > { %vm222_vm14 = vcmp.eq.s32.totalorder %v725_v21, %v198_v47  ;;  %v210_v48 = vpop.permute.xlu1 %209 }
  0xab   : > { %v487_v49 = vsel %vm222_vm14, 1.0, %v631_v25  ;;  %vm226_vm15 = vcmp.eq.s32.totalorder %v725_v21, %v210_v48 }
  0xac   : > { %v491_v51 = vsel %vm226_vm15, 1.0, %v631_v25  ;;  %503 = vmatmul.msk.f32.gmra.mxu2 %vm261_vm0, %v487_v49 }
  0xad   : > { %495 = vmatmul.msk.f32.gmra.mxu0 %vm261_vm0, %v479_v50 }
  0xae   : > { %507 = vmatmul.msk.f32.gmra.mxu3 %vm261_vm0, %v491_v51 }
  0xb1   : > { %v186_v52 = vpop.permute.xlu0 %185 }
  0xb2   : > { %vm218_vm1 = vcmp.eq.s32.totalorder %v725_v21, %v186_v52 }
  0xb3   : > { %v483_v53 = vsel %vm218_vm1, 1.0, %v631_v25 }
  0xb4   : > { %499 = vmatmul.msk.f32.gmra.mxu1 %vm261_vm0, %v483_v53 }
 0x10a   : > { %v327_v54 = vpop.f32.mrf.mxu0 }
 0x10b   : > { %375 = vst [vmem:[%s762_s4] sm:$0xff] %v327_v54 }
 0x10f   : > { %v351_v55 = vpop.f32.mrf.mxu2 }
 0x110   : > { %383 = vst [vmem:[%s762_s4 + $0x40] sm:$0xff] %v351_v55 }
 0x112   : > { %v339_v56 = vpop.f32.mrf.mxu1 }
 0x113   : > { %379 = vst [vmem:[%s762_s4 + $0x20] sm:$0xff] %v339_v56 }
 0x117   : > { %v354_v57 = vpop.f32.mrf.mxu2  ;;  %v363_v58 = vpop.f32.mrf.mxu3 }
 0x118   : > { %384 = vst [vmem:[%s762_s4 + $0x48] sm:$0xff] %v354_v57 }
 0x119   : > { %387 = vst [vmem:[%s762_s4 + $0x60] sm:$0xff] %v363_v58  ;;  %v330_v59 = vpop.f32.mrf.mxu0 }
 0x11a   : > { %376 = vst [vmem:[%s762_s4 + $0x8] sm:$0xff] %v330_v59  ;;  %v342_v60 = vpop.f32.mrf.mxu1 }
 0x11b   : > { %380 = vst [vmem:[%s762_s4 + $0x28] sm:$0xff] %v342_v60 }
 0x11f   : > { %v357_v61 = vpop.f32.mrf.mxu2 }
 0x120   : > { %385 = vst [vmem:[%s762_s4 + $0x50] sm:$0xff] %v357_v61  ;;  %v366_v62 = vpop.f32.mrf.mxu3 }
 0x121   : > { %388 = vst [vmem:[%s762_s4 + $0x68] sm:$0xff] %v366_v62 }
 0x122   : > { %v333_v63 = vpop.f32.mrf.mxu0  ;;  %v345_v0 = vpop.f32.mrf.mxu1 }
 0x123   : > { %377 = vst [vmem:[%s762_s4 + $0x10] sm:$0xff] %v333_v63 }
 0x124   : > { %381 = vst [vmem:[%s762_s4 + $0x30] sm:$0xff] %v345_v0 }
 0x129   : > { %v369_v1 = vpop.f32.mrf.mxu3 }
 0x12a   : > { %389 = vst [vmem:[%s762_s4 + $0x70] sm:$0xff] %v369_v1  ;;  %v336_v2 = vpop.f32.mrf.mxu0 }
 0x12b   : > { %378 = vst [vmem:[%s762_s4 + $0x18] sm:$0xff] %v336_v2 }
 0x12f   : > { %v360_v3 = vpop.f32.mrf.mxu2 }
 0x130   : > { %386 = vst [vmem:[%s762_s4 + $0x58] sm:$0xff] %v360_v3 }
 0x131   : > { %v372_v4 = vpop.f32.mrf.mxu3  ;;  %v348_v5 = vpop.f32.mrf.mxu1 }
 0x132   : > { %390 = vst [vmem:[%s762_s4 + $0x78] sm:$0xff] %v372_v4 }
 0x133   : > { %382 = vst [vmem:[%s762_s4 + $0x38] sm:$0xff] %v348_v5 }
 0x134   : > { %593 = shalt.err (!%p590_p3)
}
 0x135   : > { %s632_s27 = smov 128   ;;  %s633_s28 = smov 8  }
 0x136   : > { %520 = dma.vmem_to_hbm [thread:$0]  (%p687_p5), %s405_s14, 2048, %s407_s16, %s392_s13, %s632_s27, %s632_s27, %s633_s28  }
 0x137 PF: > { %p526_p4 = scmp.ge.s32.totalorder %s628_s12, 2  ;;  %s421_s29 = sand.u32 1, %s616_s9  }
 0x138   : > { %s422_s30 = scalar_lea.sflag [#allocation3], %s421_s29 }
 0x139   : > { %p523_p7 = pnand %p526_p4, %p691_p6 }
 0x13b   : > { %p524_p8 = pneg %p523_p7 }
 0x13d   : > { %611 = dma.done.wait (%p524_p8), %s422_s30, 2048  }
 0x13e   : > { %613 = vsyncadd (%p524_p8), %s422_s30, 4294965248  ;;  %p12_p9 = scmp.ge.s32.totalorder %s674_s15, 4   ;;  %s819_s9 = smov %s620_s10 }
 0x13f   : > { %s820_s10 = smov %s624_s11  ;;  %s821_s11 = smov %s685_s18 }
 0x140   : > { %s822_s12 = smov %s674_s15  ;;  %14 = sbr.rel (!%p12_p9) target bundleno = 3 (0x3), region = 63 }
 0x145   :  { %428 = vsyncpa [#allocation3], 1 }
 0x146   :  { %430 = vsyncpa [#allocation3 + $0x1], 1 }

</bundles_post_ra>
